<compile_context>
chip_gen: v6e
topology: v6e:2x2x1
jax: 0.10.0
libtpu: 0.0.40
codegen_flags: <defaults>
</compile_context>

<pallas_src>
import numpy as np
import jax
import jax.numpy as jnp
from jax.experimental import pallas as pl
from jax.experimental.pallas import tpu as pltpu


def _kernel(onehot_ref, tab_ref, out_ref):
    # (N, Vp) @ (Vp, D) -> gather + concat + projection + bias, all in one MXU pass.
    out_ref[...] = jnp.dot(onehot_ref[...], tab_ref[...],
                           preferred_element_type=jnp.float32)


def make_compound_embedding_fn(index_arrays_np, vocab_sizes, attr_dims, embed_dim):
    """
    index_arrays_np: 5 numpy int arrays (N,) — the fixed per-column indices
                     (registered buffers => compile-time constants).
    vocab_sizes:     5 ints (rows of each embedding table)
    attr_dims:       5 ints (cols of each embedding table), sum == embed_dim
    Returns a jitted forward(tables, weight, bias) -> (N, embed_dim) f32.
    """
    n = int(index_arrays_np[0].shape[0])
    d = int(embed_dim)
    assert sum(attr_dims) == d, "attribute embed dims must sum to embed_dim"

    vtot = int(sum(vocab_sizes))
    vaug = vtot + 1                       # +1: bias row / ones column
    vpad = -(-vaug // 8) * 8              # round the contraction axis up to 8 sublanes

    # ---- static one-hot (numpy, baked into the executable) -----------------
    onehot_np = np.zeros((n, vpad), np.float32)
    off = 0
    for idx, v in zip(index_arrays_np, vocab_sizes):
        idx = np.asarray(idx, np.int64)
        assert idx.min() >= 0 and idx.max() < v
        onehot_np[np.arange(n), off + idx] = 1.0
        off += v
    onehot_np[:, vtot] = 1.0              # ones column -> picks up the bias row
    onehot_const = jnp.asarray(onehot_np)

    col_offsets = np.concatenate([[0], np.cumsum(attr_dims)]).astype(int)

    @jax.jit
    def forward(tables, weight, bias):
        # Block-diagonal stack of the 5 tables: one concat of statically padded blocks.
        blocks = []
        for k, tab in enumerate(tables):
            lo = int(col_offsets[k])
            hi = d - int(col_offsets[k + 1])
            blocks.append(jnp.pad(tab.astype(jnp.float32), ((0, 0), (lo, hi))))
        blockdiag = jnp.concatenate(blocks, axis=0)                  # (Vtot, D)

        # Fold the Linear projection and bias into the table.
        tab_proj = blockdiag @ weight.T.astype(jnp.float32)          # (Vtot, D)
        tab_proj = jnp.concatenate(
            [tab_proj,
             bias.reshape(1, d).astype(jnp.float32),
             jnp.zeros((vpad - vaug, d), jnp.float32)], axis=0)      # (Vpad, D)

        return pl.pallas_call(
            _kernel,
            out_shape=jax.ShapeDtypeStruct((n, d), jnp.float32),
            in_specs=[pl.BlockSpec(memory_space=pltpu.MemorySpace.VMEM)] * 2,
            out_specs=pl.BlockSpec(memory_space=pltpu.MemorySpace.VMEM),
        )(onehot_const, tab_proj)

    return forward


def _reference(index_arrays, tables, weight, bias):
    embeds = [tab[jnp.asarray(idx)] for idx, tab in zip(index_arrays, tables)]
    combined = jnp.concatenate(embeds, axis=-1)
    return combined @ weight.T + bias


if __name__ == "__main__":
    # ---- synthetic "embedding_metadata" (deterministic, in-script) ----
    embed_dim = 32
    num_columns = 24
    vocab_sizes_d = {
        "levels": 5,
        "order_types": 3,
        "features": 4,
        "exchanges": 2,
        "trading_pairs": 6,
    }
    attr_embed_dim = embed_dim // 5                      # 6
    remaining_dim = embed_dim - attr_embed_dim * 4       # 8
    attr_dims = [attr_embed_dim] * 4 + [remaining_dim]   # [6, 6, 6, 6, 8]
    vocabs = [vocab_sizes_d["levels"], vocab_sizes_d["order_types"],
              vocab_sizes_d["features"], vocab_sizes_d["exchanges"],
              vocab_sizes_d["trading_pairs"]]

    key = jax.random.PRNGKey(0)
    keys = jax.random.split(key, 12)

    # Per-column attribute indices (the registered buffers) — constants.
    index_arrays = [
        jax.random.randint(keys[i], (num_columns,), 0, v, dtype=jnp.int32)
        for i, v in enumerate(vocabs)
    ]
    index_arrays_np = [np.asarray(idx) for idx in index_arrays]

    # Embedding tables (nn.Embedding weights), N(0,1) like torch default.
    tables = [
        jax.random.normal(keys[5 + i], (v, e), dtype=jnp.float32)
        for i, (v, e) in enumerate(zip(vocabs, attr_dims))
    ]

    # nn.Linear(embed_dim, embed_dim): uniform(-1/sqrt(D), 1/sqrt(D)).
    bound = 1.0 / np.sqrt(embed_dim)
    weight = jax.random.uniform(keys[10], (embed_dim, embed_dim),
                                minval=-bound, maxval=bound, dtype=jnp.float32)
    bias = jax.random.uniform(keys[11], (embed_dim,),
                              minval=-bound, maxval=bound, dtype=jnp.float32)

    forward = make_compound_embedding_fn(index_arrays_np, vocabs, attr_dims, embed_dim)
    out = forward(tuple(tables), weight, bias)
    out = jax.block_until_ready(out)

    ref = _reference(index_arrays_np, tables, weight, bias)
    np.testing.assert_allclose(np.asarray(out), np.asarray(ref),
                               rtol=1e-5, atol=1e-5)
    print("KERNEL_OK")
</pallas_src>

<mosaic_0001>
module attributes {stable_mosaic.version = 11 : i64} {
  func.func @_kernel(%arg0: memref<24x24xf32, #tpu.memory_space<vmem>>, %arg1: memref<24x32xf32, #tpu.memory_space<vmem>>, %arg2: memref<24x32xf32, #tpu.memory_space<vmem>>) attributes {dimension_semantics = [], scalar_prefetch = 0 : i64, scratch_operands = 0 : i64, tpu.core_type = #tpu.core_type<tc>} {
    %c0 = arith.constant 0 : index
    %c0_0 = arith.constant 0 : index
    %0 = vector.load %arg0[%c0, %c0_0] : memref<24x24xf32, #tpu.memory_space<vmem>>, vector<24x24xf32>
    %c0_1 = arith.constant 0 : index
    %c0_2 = arith.constant 0 : index
    %1 = vector.load %arg1[%c0_1, %c0_2] : memref<24x32xf32, #tpu.memory_space<vmem>>, vector<24x32xf32>
    %cst = arith.constant dense<0.000000e+00> : vector<24x32xf32>
    %2 = tpu.matmul %0, %1, %cst {dimension_numbers = #tpu.dot_dimension_numbers<[1], [0], [0], [1], [0, 0, 1, 1], [], []>} : vector<24x24xf32>, vector<24x32xf32>, vector<24x32xf32> -> vector<24x32xf32>
    %c0_3 = arith.constant 0 : index
    %c0_4 = arith.constant 0 : index
    %3 = vector.load %arg2[%c0_3, %c0_4] : memref<24x32xf32, #tpu.memory_space<vmem>>, vector<24x32xf32>
    tpu.vector_store %arg2[%c0_3, %c0_4], %2 {strides = array<i32>} : memref<24x32xf32, #tpu.memory_space<vmem>>, vector<24x32xf32>,
    return
  }
}

</mosaic_0001>

<bundles_post_ra>
// kernel: forward.1
= control target key start
LH: loop header
LB: loop body
LE: loop exit
PB: predicated region body
PF: predicated region fallthrough
CT: control target
= control target key end

     0   :  { %v185_v1 = vmov 0.0   ;;  %s226_s0 = inlined_call_operand.vmem [shape: f32[24,24], index: 0, kind: input, shape index: {}]   ;;  %s227_s1 = inlined_call_operand.vmem [shape: f32[24,32], index: 1, kind: input, shape index: {}]   ;;  %s228_s2 = inlined_call_operand.hbm [shape: f32[24,32], index: 2, kind: output, shape index: {}]  }
   0x1   :  { %v17_v0 = vld [vmem:[%s227_s1 + $0x10] sm:$0xff]  ;;  %152 = vmatprep.subr.mxu1 %v185_v1  ;;  %137 = vmatprep.subr.mxu0 %v185_v1  ;;  %v16_v2 = vld [vmem:[%s227_s1 + $0x8] sm:$0xff] }
   0x2   :  { %155 = vmatpush3.msra.mxu1 %v17_v0  ;;  %138 = vmatpush3.msra.mxu0 %v17_v0 }
   0x3   :  { %7 = vsyncpa [#allocation3], 0  ;;  %153 = vmatprep.subr.mxu1 %v185_v1  ;;  %139 = vmatprep.subr.mxu0 %v185_v1  ;;  %v15_v3 = vld [vmem:[%s227_s1] sm:$0xff]  ;;  %v13_v4 = vld [vmem:[%s226_s0 + $0x8] sm:$0xff]  ;;  %vm18_vm0 = vcmask 195584   ;;  %vm186_vm1 = vmmov 0  }
   0x4   :  { %156 = vmatpush3.msra.mxu1 %v16_v2  ;;  %140 = vmatpush3.msra.mxu0 %v16_v2  ;;  %v12_v5 = vld [vmem:[%s226_s0] sm:$0xff]  ;;  %v14_v6 = vld [vmem:[%s226_s0 + $0x10] sm:$0xff]  ;;  %vm108_vm2 = vcmask 261120   ;;  %s187_s20 = smov [#allocation2]  }
   0x5   :  { %154 = vmatprep.subr.mxu1 %v185_v1  ;;  %146 = vmatprep.mubr.msk.f32.mxu1 %vm186_vm1, %v185_v1  ;;  %s117_s21 = sshll.u32 %s187_s20, 4  ;;  %s118_s21 = int_to_ptr.vmem [resolvable:$true] %s117_s21 }
   0x6   :  { %157 = vmatpush3.msra.mxu1 %v15_v3  ;;  %141 = vmatprep.subr.mxu0 %v185_v1  ;;  %s163_s22 = scalar_lea.vmem %s118_s21, 384  ;;  %p168_p1 = scmp.lt.s32.totalorder %s118_s21, %s118_s21 }
   0x7   :  { %147 = vmatmul.mubr.msk.f32.vlgmr.msra.gmra.mxu1 %vm18_vm0, %v13_v4  ;;  %142 = vmatpush3.msra.mxu0 %v15_v3  ;;  %p164_p0 = scmp.ne.s32.totalorder %s118_s21, %s163_s22  ;;  %p169_p2 = scmp.lt.s32.totalorder %s163_s22, %s163_s22 }
   0x8   :  { %143 = vmatprep.mubr.msk.f32.mxu0 %vm186_vm1, %v185_v1  ;;  %149 = vmatprep.mubr.msk.f32.mxu1 %vm186_vm1, %v185_v1 }
   0x9   :  { %144 = vmatmul.mubr.msk.f32.vlgmr.msra.gmra.mxu0 %vm18_vm0, %v12_v5  ;;  %p170_p3 = por %p169_p2, %p168_p1 }
   0xb   :  { %150 = vmatmul.mubr.msk.f32.gmra.mxu1 %vm18_vm0, %v14_v6  ;;  %p171_p4 = pnand %p170_p3, %p164_p0 }
  0xc7   :  { %v99_v7 = vpop.f32.mrf.mxu1 }
  0xc8   :  { %110 = vst.msk [vmem:[#allocation2 + $0x8] sm:$0xff] %vm108_vm2, %v99_v7 }
  0xc9   :  { %v94_v8 = vpop.f32.mrf.mxu0  ;;  %v148_v9 = vpop.f32.mrf.mxu1 }
  0xca   :  { %109 = vst.msk [vmem:[#allocation2] sm:$0xff] %vm108_vm2, %v94_v8 }
  0xcb   :  { %v145_v10 = vpop.f32.mrf.mxu0  ;;  %v104_v11 = vpop.f32.mrf.mxu1 }
  0xcc   :  { %111 = vst.msk [vmem:[#allocation2 + $0x10] sm:$0xff] %vm108_vm2, %v104_v11 }
  0xcd   :  { %v151_v12 = vpop.f32.mrf.mxu1 }
  0xce   :  { %174 = shalt.err (!%p171_p4)
}
  0xcf   :  { %s188_s0 = smov 128   ;;  %s189_s23 = smov 8  }
  0xd0   :  { %123 = dma.vmem_to_hbm [thread:$0]  %s118_s21, 384, %s228_s2, [#allocation3], %s188_s0, %s188_s0, %s189_s23  }
  0xd1   :  { %183 = dma.done.wait [#allocation3], 384  }
  0xd2   :  { %184 = vsyncadd [#allocation3], 4294966912 }
  0xd3   :  { %127 = vsyncpa [#allocation3], 1 }

</bundles_post_ra>
